<compile_context>
chip_gen: v6e
topology: v6e:2x2x1
jax: 0.10.0
libtpu: 0.0.40
codegen_flags: <defaults>
</compile_context>

<pallas_src>
import jax
import jax.numpy as jnp
from jax.experimental import pallas as pl
from jax.experimental.pallas import tpu as pltpu


def _round_up(n, m):
    return ((n + m - 1) // m) * m


def mlp_kernel(x_ref, w1_ref, b1_ref, w2_ref, b2_ref, o_ref):
    """Fused MLP on a lane-dense (batch-last) layout.

    x_ref : (IN, TB)   transposed input tile (batch on lanes)
    w1_ref: (H, IN)    layer-1 weight (PyTorch layout, used as matmul LHS)
    b1_ref: (H, 1)     layer-1 bias (column)
    w2_ref: (H, 1)     layer-2 weight (column)
    b2_ref: (1, 1)     layer-2 bias
    o_ref : (1, TB)    output row (batch on lanes)
    """
    # Layer 1: (H, IN) @ (IN, TB) -> (H, TB) on the MXU, f32 accumulation.
    hidden = jnp.dot(w1_ref[...], x_ref[...], preferred_element_type=jnp.float32)
    hidden = jnp.maximum(hidden + b1_ref[...], 0.0)
    # Layer 2 (N=1): VPU multiply + sublane (XLU) reduction -- keeps the
    # degenerate-width matmul off the MXU and shortens the dependency chain.
    out = jnp.sum(hidden * w2_ref[...], axis=0, keepdims=True) + b2_ref[...]
    o_ref[...] = out.astype(o_ref.dtype)


def prepare_params(w1, b1, w2, b2):
    """One-time parameter prep (done at model load, not per forward call).

    w1: (H, 5)  PyTorch nn.Linear weight -> kept as-is (LHS of W1 @ x^T)
    b1: (H,)    -> (H, 1) column
    w2: (1, H)  -> (H, 1) column
    b2: (1,)    -> (1, 1)
    """
    H = w1.shape[0]
    return (
        jnp.asarray(w1, jnp.float32),
        jnp.asarray(b1, jnp.float32).reshape(H, 1),
        jnp.asarray(w2, jnp.float32).reshape(H, 1),
        jnp.asarray(b2, jnp.float32).reshape(1, 1),
    )


def my_model_forward(x, params, *, tile_b=512):
    """Forward pass: relu(x @ W1^T + b1) @ W2^T + b2, then .squeeze().

    x      : (B, 5) float32
    params : output of prepare_params
    tile_b : lane tile for large-batch tiling (multiple of 128)
    """
    w1, b1_col, w2_col, b2_2d = params
    B, in_dim = x.shape
    H = w1.shape[0]

    # Lane-dense layout: put batch on the lane axis, pad to a lane multiple.
    x_t = x.T.astype(jnp.float32)                      # (IN, B)
    tb = min(tile_b, _round_up(B, 128))                # multiple of 128
    padded_b = _round_up(B, tb)
    if padded_b != B:
        x_t = jnp.pad(x_t, ((0, 0), (0, padded_b - B)))
    num_tiles = padded_b // tb

    out_shape = jax.ShapeDtypeStruct((1, padded_b), jnp.float32)

    if num_tiles == 1:
        # No grid: whole arrays as single VMEM blocks, zero pipeline overhead.
        out = pl.pallas_call(
            mlp_kernel,
            out_shape=out_shape,
            in_specs=[pl.BlockSpec(memory_space=pltpu.MemorySpace.VMEM)] * 5,
            out_specs=pl.BlockSpec(memory_space=pltpu.MemorySpace.VMEM),
        )(x_t, w1, b1_col, w2_col, b2_2d)
    else:
        # Tile the batch (lane) axis; weights/biases stay resident across tiles.
        out = pl.pallas_call(
            mlp_kernel,
            out_shape=out_shape,
            grid=(num_tiles,),
            in_specs=[
                pl.BlockSpec((in_dim, tb), lambda i: (0, i)),
                pl.BlockSpec((H, in_dim), lambda i: (0, 0)),
                pl.BlockSpec((H, 1), lambda i: (0, 0)),
                pl.BlockSpec((H, 1), lambda i: (0, 0)),
                pl.BlockSpec((1, 1), lambda i: (0, 0)),
            ],
            out_specs=pl.BlockSpec((1, tb), lambda i: (0, i)),
            compiler_params=pltpu.CompilerParams(
                dimension_semantics=("parallel",),
            ),
        )(x_t, w1, b1_col, w2_col, b2_2d)

    # result.squeeze(): (B,) for B > 1, scalar for B == 1 (matches torch).
    return jnp.squeeze(out[0, :B])


if __name__ == "__main__":
    # hyper_params = {'size': 32}
    H = 32          # hidden size
    IN = 5          # fixed input feature dim of the module

    key = jax.random.PRNGKey(0)
    kx, kw1, kb1, kw2, kb2, kx2 = jax.random.split(key, 6)

    # Deterministic PyTorch-style uniform(-1/sqrt(fan_in), 1/sqrt(fan_in)) init.
    bound1 = 1.0 / jnp.sqrt(IN)
    bound2 = 1.0 / jnp.sqrt(H)
    w1 = jax.random.uniform(kw1, (H, IN), jnp.float32, -bound1, bound1)
    b1 = jax.random.uniform(kb1, (H,), jnp.float32, -bound1, bound1)
    w2 = jax.random.uniform(kw2, (1, H), jnp.float32, -bound2, bound2)
    b2 = jax.random.uniform(kb2, (1,), jnp.float32, -bound2, bound2)

    params = prepare_params(w1, b1, w2, b2)

    def ref_fn(xin):
        return jnp.squeeze(jnp.maximum(xin @ w1.T + b1, 0.0) @ w2.T + b2)

    # Small batch -> single whole-block call (no grid).
    B = 8
    x = jax.random.normal(kx, (B, IN), jnp.float32)
    result = jax.block_until_ready(my_model_forward(x, params))
    assert result.shape == (B,)
    assert jnp.allclose(result, ref_fn(x), atol=1e-5, rtol=1e-5)

    # Larger batch with a small tile to exercise the tiled "parallel" grid path.
    B2 = 300
    x2 = jax.random.normal(kx2, (B2, IN), jnp.float32)
    result2 = jax.block_until_ready(my_model_forward(x2, params, tile_b=128))
    assert result2.shape == (B2,)
    assert jnp.allclose(result2, ref_fn(x2), atol=1e-5, rtol=1e-5)

    print("KERNEL_OK")
</pallas_src>

<mosaic_0001>
module attributes {stable_mosaic.version = 11 : i64} {
  func.func @mlp_kernel(%arg0: memref<5x128xf32, #tpu.memory_space<vmem>>, %arg1: memref<32x5xf32, #tpu.memory_space<vmem>>, %arg2: memref<32x1xf32, #tpu.memory_space<vmem>>, %arg3: memref<32x1xf32, #tpu.memory_space<vmem>>, %arg4: memref<1x1xf32, #tpu.memory_space<vmem>>, %arg5: memref<1x128xf32, #tpu.memory_space<vmem>>) attributes {dimension_semantics = [], scalar_prefetch = 0 : i64, scratch_operands = 0 : i64, tpu.core_type = #tpu.core_type<tc>} {
    %c0 = arith.constant 0 : index
    %c0_0 = arith.constant 0 : index
    %0 = vector.load %arg1[%c0, %c0_0] : memref<32x5xf32, #tpu.memory_space<vmem>>, vector<32x5xf32>
    %c0_1 = arith.constant 0 : index
    %c0_2 = arith.constant 0 : index
    %1 = vector.load %arg0[%c0_1, %c0_2] : memref<5x128xf32, #tpu.memory_space<vmem>>, vector<5x128xf32>
    %cst = arith.constant dense<0.000000e+00> : vector<32x128xf32>
    %2 = tpu.matmul %0, %1, %cst {dimension_numbers = #tpu.dot_dimension_numbers<[1], [0], [0], [1], [0, 0, 1, 1], [], []>} : vector<32x5xf32>, vector<5x128xf32>, vector<32x128xf32> -> vector<32x128xf32>
    %c0_3 = arith.constant 0 : index
    %c0_4 = arith.constant 0 : index
    %3 = vector.load %arg2[%c0_3, %c0_4] : memref<32x1xf32, #tpu.memory_space<vmem>>, vector<32x1xf32>
    %4 = vector.broadcast %3 : vector<32x1xf32> to vector<32x128xf32>
    %5 = arith.addf %2, %4 : vector<32x128xf32>
    %cst_5 = arith.constant 0.000000e+00 : f32
    %6 = vector.broadcast %cst_5 : f32 to vector<32x128xf32>
    %7 = arith.maximumf %5, %6 : vector<32x128xf32>
    %c0_6 = arith.constant 0 : index
    %c0_7 = arith.constant 0 : index
    %8 = vector.load %arg3[%c0_6, %c0_7] : memref<32x1xf32, #tpu.memory_space<vmem>>, vector<32x1xf32>
    %9 = vector.broadcast %8 : vector<32x1xf32> to vector<32x128xf32>
    %10 = arith.mulf %7, %9 : vector<32x128xf32>
    %cst_8 = arith.constant dense<0.000000e+00> : vector<128xf32>
    %11 = vector.multi_reduction <add>, %10, %cst_8 [0] : vector<32x128xf32> to vector<128xf32>
    %12 = vector.shape_cast %11 : vector<128xf32> to vector<1x128xf32>
    %c0_9 = arith.constant 0 : index
    %c0_10 = arith.constant 0 : index
    %13 = vector.load %arg4[%c0_9, %c0_10] : memref<1x1xf32, #tpu.memory_space<vmem>>, vector<1x1xf32>
    %14 = vector.broadcast %13 : vector<1x1xf32> to vector<1x128xf32>
    %15 = arith.addf %12, %14 : vector<1x128xf32>
    %c0_11 = arith.constant 0 : index
    %c0_12 = arith.constant 0 : index
    %16 = vector.load %arg5[%c0_11, %c0_12] : memref<1x128xf32, #tpu.memory_space<vmem>>, vector<1x128xf32>
    tpu.vector_store %arg5[%c0_11, %c0_12], %15 {strides = array<i32>} : memref<1x128xf32, #tpu.memory_space<vmem>>, vector<1x128xf32>,
    return
  }
}

</mosaic_0001>

<bundles_post_ra>
// kernel: tpu_custom_call.1
= control target key start
LH: loop header
LB: loop body
LE: loop exit
PB: predicated region body
PF: predicated region fallthrough
CT: control target
= control target key end

     0   :  { %s344_s0 = inlined_call_operand.vmem [shape: f32[5,128], index: 0, kind: input, shape index: {}]   ;;  %s345_s1 = inlined_call_operand.vmem [shape: f32[32,5], index: 1, kind: input, shape index: {}]   ;;  %s346_s2 = inlined_call_operand.vmem [shape: f32[32,1], index: 2, kind: input, shape index: {}]   ;;  %s347_s3 = inlined_call_operand.vmem [shape: f32[32,1], index: 3, kind: input, shape index: {}]   ;;  %s348_s4 = inlined_call_operand.<no memory space> [shape: f32[1,1], index: 4, kind: input, shape index: {}]   ;;  %s349_s5 = inlined_call_operand.hbm [shape: f32[1,128], index: 5, kind: output, shape index: {}]  }
   0x1   :  { %v10_v0 = vstv %s348_s4 }
   0x2   :  { %11 = vst [vmem:[#allocation2] sm:$0x1] %v10_v0 }
   0x3   :  { %v27_v1 = vld [vmem:[%s344_s0] sm:$0x1f]  ;;  %vm65_vm0 = vcmask 1044480   ;;  %vm52_vm1 = vcmask 39936   ;;  %v25_v3 = vld [vmem:[%s345_s1 + $0x10] sm:$0xff]  ;;  %v24_v4 = vld [vmem:[%s345_s1 + $0x8] sm:$0xff] }
   0x4   :  { %v23_v2 = vld [vmem:[%s345_s1] sm:$0xff]  ;;  %231 = vmatprep.subr.msk.mxu0 %vm65_vm0, %v27_v1  ;;  %239 = vmatprep.subr.msk.mxu1 %vm65_vm0, %v27_v1  ;;  %v26_v5 = vld [vmem:[%s345_s1 + $0x18] sm:$0xff]  ;;  %v30_v7 = vld [vmem:[%s346_s2 + $0x10] sm:$0xff] }
   0x5   :  { %232 = vmatpush3.msk.msra.mxu0 %vm65_vm0, %v27_v1  ;;  %240 = vmatpush3.msk.msra.mxu1 %vm65_vm0, %v27_v1  ;;  %v28_v6 = vld [vmem:[%s346_s2] sm:$0xff] }
   0x6   :  { %233 = vmatprep.mubr.msk.f32.mxu0 %vm52_vm1, %v23_v2  ;;  %236 = vmatprep.mubr.msk.f32.mxu1 %vm52_vm1, %v25_v3 }
   0x7   :  { %234 = vmatmul.mubr.msk.f32.vlgmr.msra.gmra.mxu0 %vm52_vm1, %v24_v4  ;;  %237 = vmatmul.mubr.msk.f32.vlgmr.msra.gmra.mxu1 %vm52_vm1, %v26_v5 }
   0x8   :  { %12 = vsyncpa [#allocation4], 0  ;;  %v267_v8 = vmov 0   ;;  %v29_v9 = vld [vmem:[%s346_s2 + $0x8] sm:$0xff]  ;;  %v31_v10 = vld [vmem:[%s346_s2 + $0x18] sm:$0xff]  ;;  %v201_v42 = vlaneseq  ;;  %s268_s2 = smov [#allocation3]  }
   0x9   :  { %243 = vset.pattern.permute.xlu0 %v267_v8  ;;  %244 = vset.pattern.permute.xlu1 %v267_v8  ;;  %v158_v11 = vld [vmem:[%s347_s3] sm:$0xff]  ;;  %v159_v12 = vld [vmem:[%s347_s3 + $0x8] sm:$0xff]  ;;  %v160_v13 = vld [vmem:[%s347_s3 + $0x10] sm:$0xff] }
   0xa   :  { %34 = vperm.xlu0 %243, %v28_v6   ;;  %44 = vperm.xlu1 %244, %v30_v7   ;;  %v161_v14 = vld [vmem:[%s347_s3 + $0x18] sm:$0xff]  ;;  %v195_v15 = vld [vmem:[#allocation2] sm:$0x1]  ;;  %v202_v45 = vshrl.u32 %v201_v42, 7  ;;  %s213_s3 = sshll.u32 %s268_s2, 4  ;;  %s214_s3 = int_to_ptr.vmem [resolvable:$true] %s213_s3 }
   0xb   :  { %s245_s18 = scalar_lea.vmem %s214_s3, 16  ;;  %s249_s19 = scalar_lea.vmem %s214_s3, 32 }
   0xc   :  { %v203_v48 = vsub.s32 0, %v202_v45  ;;  %p246_p0 = scmp.ne.s32.totalorder %s214_s3, %s245_s18  ;;  %p250_p1 = scmp.lt.s32.totalorder %s214_s3, %s214_s3 }
   0xd   :  { %p251_p2 = scmp.lt.s32.totalorder %s249_s19, %s245_s18 }
   0xe   :  { %39 = vperm.xlu0 %243, %v29_v9   ;;  %49 = vperm.xlu1 %244, %v31_v10  }
   0xf   :  { %p252_p3 = por %p251_p2, %p250_p1 }
  0x11   :  { %p253_p4 = pnand %p252_p3, %p246_p0 }
  0x12   :  { %164 = vperm.xlu0 %243, %v158_v11   ;;  %169 = vperm.xlu1 %244, %v159_v12  }
  0x16   :  { %174 = vperm.xlu0 %243, %v160_v13   ;;  %179 = vperm.xlu1 %244, %v161_v14  }
  0x1a   :  { %198 = vperm.xlu0 %243, %v195_v15  }
  0x85   :  { %v35_v16 = vpop.permute.xlu0 %34  ;;  %v45_v17 = vpop.permute.xlu1 %44 }
  0x89   :  { %v40_v18 = vpop.permute.xlu0 %39  ;;  %v50_v19 = vpop.permute.xlu1 %49 }
  0x8d   :  { %v165_v22 = vpop.permute.xlu0 %164  ;;  %v170_v30 = vpop.permute.xlu1 %169 }
  0x91   :  { %v175_v36 = vpop.permute.xlu0 %174  ;;  %v180_v39 = vpop.permute.xlu1 %179 }
  0x95   :  { %v199_v50 = vpop.permute.xlu0 %198 }
  0x96   :  { %v204_v52 = vrot.slane %v199_v50, %v203_v48 }
  0xc7   :  { %v235_v20 = vpop.f32.mrf.mxu0  ;;  %v238_v21 = vpop.f32.mrf.mxu1 }
  0xc8   :  { %v141_v23 = vadd.f32 %v235_v20, %v40_v18  ;;  %v151_v27 = vadd.f32 %v238_v21, %v50_v19 }
  0xc9   :  { %v135_v24 = vpop.f32.mrf.mxu0  ;;  %v145_v25 = vpop.f32.mrf.mxu1 }
  0xca   :  { %v155_v26 = vmax.f32 %v141_v23, 0.0  ;;  %v136_v28 = vadd.f32 %v135_v24, %v35_v16  ;;  %v146_v29 = vadd.f32 %v145_v25, %v45_v17  ;;  %v157_v34 = vmax.f32 %v151_v27, 0.0 }
  0xcc   :  { %v154_v31 = vmax.f32 %v136_v28, 0.0  ;;  %v156_v32 = vmax.f32 %v146_v29, 0.0  ;;  %v183_v33 = vmul.f32 %v170_v30, %v155_v26  ;;  %v185_v40 = vmul.f32 %v180_v39, %v157_v34 }
  0xce   :  { %v182_v35 = vmul.f32 %v165_v22, %v154_v31  ;;  %v184_v38 = vmul.f32 %v175_v36, %v156_v32 }
  0xd0   :  { %v186_v37 = vadd.f32 %v183_v33, %v182_v35 }
  0xd2   :  { %v187_v41 = vadd.f32 %v186_v37, %v184_v38 }
  0xd4   :  { %v188_v43 = vadd.f32 %v187_v41, %v185_v40 }
  0xd6   :  { %v189_v44 = vrot.slane %v188_v43, 4 }
  0xd8   :  { %v190_v46 = vadd.f32 %v189_v44, %v188_v43 }
  0xda   :  { %v191_v47 = vrot.slane %v190_v46, 2 }
  0xdc   :  { %v192_v49 = vadd.f32 %v191_v47, %v190_v46 }
  0xde   :  { %v193_v51 = vrot.slane %v192_v49, 1 }
  0xe0   :  { %v194_v53 = vadd.f32 %v193_v51, %v192_v49 }
  0xe2   :  { %v205_v54 = vadd.f32 %v204_v52, %v194_v53 }
  0xe4   :  { %206 = vst [vmem:[#allocation3] sm:$0x1] %v205_v54 }
  0xe5   :  { %256 = shalt.err (!%p253_p4)
}
  0xe6   :  { %216 = dma.vmem_to_hbm [thread:$0]  %s214_s3, 16, %s349_s5, [#allocation4]  }
  0xe7   :  { %265 = dma.done.wait [#allocation4], 16  }
  0xe8   :  { %266 = vsyncadd [#allocation4], 4294967280 }
  0xe9   :  { %220 = vsyncpa [#allocation4], 1 }

</bundles_post_ra>
